<compile_context>
chip_gen: v5e
topology: v5e:2x2
jax: 0.10.0
libtpu: 0.0.40
codegen_flags: <defaults>
</compile_context>

<pallas_src>
import functools

import jax
import jax.numpy as jnp
from jax.experimental import pallas as pl
from jax.experimental.pallas import tpu as pltpu


def _round_up(x, m):
    return ((x + m - 1) // m) * m


# ---------------- conv1: 3x3 / s1 / p1 + ReLU, tap-folded kernel -------------

def _conv3x3_relu_row_kernel(x0_ref, x1_ref, x2_ref, w_ref, b_ref, o_ref, *,
                             width, cin):
    # x{kh}_ref: (1, 1, W+2, Cin) bf16 -- padded input row h + kh
    # w_ref:     (9*Cin, d)       bf16 -- rows ordered (kh, kw, cin), resident
    # b_ref:     (1, d)           f32
    # o_ref:     (1, 1, W, d)     bf16
    d = o_ref.shape[-1]
    acc = jnp.zeros((width, d), jnp.float32)
    rows = (x0_ref[...], x1_ref[...], x2_ref[...])        # (1,1,W+2,Cin) each
    for kh in range(3):
        row = rows[kh][0, 0]                              # (W+2, Cin) value
        for kw in range(3):
            a = row[kw:kw + width, :]                     # (W, Cin)
            t = kh * 3 + kw
            wt = w_ref[t * cin:(t + 1) * cin, :]          # (Cin, d) static slice
            acc = acc + jnp.dot(a, wt, preferred_element_type=jnp.float32)
    out = jnp.maximum(acc + b_ref[...], 0.0)
    o_ref[...] = out.reshape(o_ref.shape).astype(o_ref.dtype)


def conv3x3_relu(x_nhwc, w_hwio, bias):
    """3x3 stride-1 pad-1 conv + ReLU, NHWC in / NHWC out (bf16)."""
    n, h, w, cin = x_nhwc.shape
    d = w_hwio.shape[-1]

    xp = jnp.pad(x_nhwc.astype(jnp.bfloat16), ((0, 0), (1, 1), (1, 1), (0, 0)))
    wm = w_hwio.reshape(9 * cin, d).astype(jnp.bfloat16)   # (kh, kw, cin) rows
    b2 = bias.astype(jnp.float32).reshape(1, d)

    # VMEM budget: 2 buffers x (3 row blocks + resident weight + out + bias).
    a_blk = (w + 2) * cin * 2
    need = 2 * (3 * a_blk + 9 * cin * d * 2 + w * d * 2 + d * 4) + (2 << 20)
    vmem = int(min(max(need, 32 << 20), 64 << 20))

    def _row_spec(kh):
        return pl.BlockSpec((1, 1, w + 2, cin),
                            lambda bi, hi: (bi, hi + kh, 0, 0))

    kernel = functools.partial(_conv3x3_relu_row_kernel, width=w, cin=cin)
    return pl.pallas_call(
        kernel,
        out_shape=jax.ShapeDtypeStruct((n, h, w, d), jnp.bfloat16),
        grid_spec=pltpu.PrefetchScalarGridSpec(
            num_scalar_prefetch=0,
            grid=(n, h),
            in_specs=[
                _row_spec(0), _row_spec(1), _row_spec(2),
                pl.BlockSpec((9 * cin, d), lambda bi, hi: (0, 0)),   # resident W
                pl.BlockSpec((1, d), lambda bi, hi: (0, 0)),         # bias
            ],
            out_specs=pl.BlockSpec((1, 1, w, d), lambda bi, hi: (bi, hi, 0, 0)),
        ),
        compiler_params=pltpu.CompilerParams(
            dimension_semantics=("parallel", "parallel"),
            vmem_limit_bytes=vmem,
        ),
    )(xp, xp, xp, wm, b2)


# ------------- ConvTranspose (k=2, s=2) per-pixel GEMM, N-tiled ---------------

def _gemm_bias_kernel(a_ref, w_ref, b_ref, o_ref):
    # Single-K GEMM: no accumulator scratch, compute + bias + store directly.
    o_ref[...] = (jnp.dot(a_ref[...], w_ref[...],
                          preferred_element_type=jnp.float32)
                  + b_ref[...]).astype(o_ref.dtype)


def gemm_bias(a, wmat, bias, *, out_dtype=jnp.float32,
              tm_target=512, tn_target=2304):
    """out = a @ wmat + bias -- bf16 operands on the MXU, f32 accumulation."""
    m, k = a.shape
    k2, ncols = wmat.shape
    assert k == k2 and bias.shape == (ncols,)

    a = a.astype(jnp.bfloat16)
    wmat = wmat.astype(jnp.bfloat16)
    bias = bias.astype(jnp.float32)

    tm = min(tm_target, _round_up(m, 16))
    mp = _round_up(m, tm)
    n128 = _round_up(ncols, 128)
    tn = min(_round_up(tn_target, 128), n128)
    np_ = _round_up(n128, tn)

    if mp != m:
        a = jnp.pad(a, ((0, mp - m), (0, 0)))
    if np_ != ncols:
        wmat = jnp.pad(wmat, ((0, 0), (0, np_ - ncols)))
        bias = jnp.pad(bias, (0, np_ - ncols))
    b2 = bias.reshape(1, np_)

    grid = (np_ // tn, mp // tm)        # weight-stationary inner sweep over M
    out = pl.pallas_call(
        _gemm_bias_kernel,
        out_shape=jax.ShapeDtypeStruct((mp, np_), out_dtype),
        grid_spec=pltpu.PrefetchScalarGridSpec(
            num_scalar_prefetch=0,
            grid=grid,
            in_specs=[
                pl.BlockSpec((tm, k), lambda j, i: (i, 0)),   # activations
                pl.BlockSpec((k, tn), lambda j, i: (0, j)),   # weight column tile
                pl.BlockSpec((1, tn), lambda j, i: (0, j)),   # bias tile
            ],
            out_specs=pl.BlockSpec((tm, tn), lambda j, i: (i, j)),
        ),
        compiler_params=pltpu.CompilerParams(
            dimension_semantics=("parallel", "parallel"),
        ),
    )(a, wmat, b2)

    if mp != m or np_ != ncols:
        out = out[:m, :ncols]
    return out


# ------------------------------ module forward -------------------------------

def custom_fusion_forward(x_nchw, params):
    """Equivalent of CustomFusion.forward (NCHW in / NCHW out)."""
    n, cin, h, w = x_nchw.shape
    x = jnp.transpose(x_nchw, (0, 2, 3, 1))                   # NHWC

    # ---- conv1: 3x3, stride 1, pad 1, fused ReLU (tap-folded, no im2col) ----
    hmap = conv3x3_relu(x, params["w1"], params["b1"])         # (N,H,W,d) bf16
    d = hmap.shape[-1]

    # ---- ConvTranspose2d k=2, s=2 == per-pixel GEMM + pixel shuffle ---------
    wt = params["wt"]                                          # (d, Cout, 2, 2)
    cout = wt.shape[1]
    wm2 = jnp.transpose(wt, (0, 2, 3, 1)).reshape(d, 4 * cout)  # cols (kh,kw,co)
    b2 = jnp.tile(params["bt"], 4)                             # co fastest
    y = gemm_bias(hmap.reshape(n * h * w, d), wm2, b2,
                  out_dtype=jnp.float32)                       # (N*H*W, 4*Cout)

    # Single fused relayout: (n,h,w,kh,kw,co) -> (n,co,h,kh,w,kw) -> NCHW.
    y = y.reshape(n, h, w, 2, 2, cout)
    y = jnp.transpose(y, (0, 5, 1, 3, 2, 4)).reshape(n, cout, 2 * h, 2 * w)
    return y


# --------------------------- pure-JAX reference ------------------------------

def reference_forward(x_nchw, params):
    w1 = jnp.transpose(params["w1"], (3, 2, 0, 1))             # HWIO -> OIHW
    y = jax.lax.conv_general_dilated(
        x_nchw, w1, window_strides=(1, 1), padding=((1, 1), (1, 1)),
        dimension_numbers=("NCHW", "OIHW", "NCHW"),
        precision=jax.lax.Precision.HIGHEST)
    y = jnp.maximum(y + params["b1"][None, :, None, None], 0.0)

    wt = params["wt"]                                          # (d, Cout, 2, 2)
    n, _, h, w = y.shape
    cout = wt.shape[1]
    # Y[n, co, 2h+kh, 2w+kw] = b[co] + sum_ci X[n, ci, h, w] * W[ci, co, kh, kw]
    z = jnp.einsum('nchw,cokl->nohwkl', y, wt,
                   precision=jax.lax.Precision.HIGHEST)
    z = jnp.transpose(z, (0, 1, 2, 4, 3, 5)).reshape(n, cout, 2 * h, 2 * w)
    return z + params["bt"][None, :, None, None]


# ----------------------------------- main -------------------------------------

if __name__ == "__main__":
    # Small shapes consistent with the module (real: Cin=2048, d_hidn=512, Cout=2304).
    B, CIN, S = 2, 8, 16
    D_HIDN = 32
    COUT = 16

    key = jax.random.PRNGKey(0)
    k_x, k_w1, k_b1, k_wt, k_bt = jax.random.split(key, 5)

    x = jax.random.normal(k_x, (B, CIN, S, S), dtype=jnp.float32)
    params = {
        # conv1: Cin -> d_hidn, k=3 (HWIO)
        "w1": 0.05 * jax.random.normal(k_w1, (3, 3, CIN, D_HIDN), dtype=jnp.float32),
        "b1": 0.01 * jax.random.normal(k_b1, (D_HIDN,), dtype=jnp.float32),
        # ConvTranspose2d: d_hidn -> Cout, k=2, s=2 (PyTorch (Cin, Cout, kH, kW))
        "wt": 0.05 * jax.random.normal(k_wt, (D_HIDN, COUT, 2, 2), dtype=jnp.float32),
        "bt": 0.01 * jax.random.normal(k_bt, (COUT,), dtype=jnp.float32),
    }

    out = jax.block_until_ready(jax.jit(custom_fusion_forward)(x, params))
    ref = jax.block_until_ready(reference_forward(x, params))

    assert out.shape == (B, COUT, 2 * S, 2 * S), out.shape
    max_err = float(jnp.max(jnp.abs(out - ref)))
    assert max_err < 2e-2, max_err   # bf16 operands, f32 accumulation
    print("KERNEL_OK")
</pallas_src>

<mosaic_0001>
module attributes {stable_mosaic.version = 11 : i64} {
  func.func @_gemm_bias_kernel(%arg0: i32, %arg1: i32, %arg2: memref<512x32xbf16, #tpu.memory_space<vmem>>, %arg3: memref<32x128xbf16, #tpu.memory_space<vmem>>, %arg4: memref<1x128xf32, #tpu.memory_space<vmem>>, %arg5: memref<512x128xf32, #tpu.memory_space<vmem>>) attributes {dimension_semantics = [#tpu.dimension_semantics<parallel>, #tpu.dimension_semantics<parallel>], iteration_bounds = array<i64: 1, 1>, scalar_prefetch = 0 : i64, scratch_operands = 0 : i64, tpu.core_type = #tpu.core_type<tc>, window_params = [{transform_indices = @transform_0, window_bounds = array<i64: 512, 32>}, {transform_indices = @transform_1, window_bounds = array<i64: 32, 128>}, {transform_indices = @transform_2, window_bounds = array<i64: 1, 128>}, {transform_indices = @transform_3, window_bounds = array<i64: 512, 128>}]} {
    %c0 = arith.constant 0 : index
    %c0_0 = arith.constant 0 : index
    %0 = vector.load %arg2[%c0, %c0_0] : memref<512x32xbf16, #tpu.memory_space<vmem>>, vector<512x32xbf16>
    %c0_1 = arith.constant 0 : index
    %c0_2 = arith.constant 0 : index
    %1 = vector.load %arg3[%c0_1, %c0_2] : memref<32x128xbf16, #tpu.memory_space<vmem>>, vector<32x128xbf16>
    %cst = arith.constant dense<0.000000e+00> : vector<512x128xf32>
    %2 = tpu.matmul %0, %1, %cst {dimension_numbers = #tpu.dot_dimension_numbers<[1], [0], [0], [1], [0, 0, 1, 1], [], []>} : vector<512x32xbf16>, vector<32x128xbf16>, vector<512x128xf32> -> vector<512x128xf32>
    %c0_3 = arith.constant 0 : index
    %c0_4 = arith.constant 0 : index
    %3 = vector.load %arg4[%c0_3, %c0_4] : memref<1x128xf32, #tpu.memory_space<vmem>>, vector<1x128xf32>
    %4 = vector.broadcast %3 : vector<1x128xf32> to vector<512x128xf32>
    %5 = arith.addf %2, %4 : vector<512x128xf32>
    %c0_5 = arith.constant 0 : index
    %c0_6 = arith.constant 0 : index
    %6 = vector.load %arg5[%c0_5, %c0_6] : memref<512x128xf32, #tpu.memory_space<vmem>>, vector<512x128xf32>
    tpu.vector_store %arg5[%c0_5, %c0_6], %5 {strides = array<i32>} : memref<512x128xf32, #tpu.memory_space<vmem>>, vector<512x128xf32>,
    return
  }
  func.func @transform_0(%arg0: i32, %arg1: i32) -> (i32, i32) {
    %c0_i32 = arith.constant 0 : i32
    %c0_i32_0 = arith.constant 0 : i32
    return %arg1, %c0_i32 : i32, i32
  }
  func.func @transform_1(%arg0: i32, %arg1: i32) -> (i32, i32) {
    %c0_i32 = arith.constant 0 : i32
    %c0_i32_0 = arith.constant 0 : i32
    return %c0_i32, %arg0 : i32, i32
  }
  func.func @transform_2(%arg0: i32, %arg1: i32) -> (i32, i32) {
    %c0_i32 = arith.constant 0 : i32
    %c0_i32_0 = arith.constant 0 : i32
    return %c0_i32, %arg0 : i32, i32
  }
  func.func @transform_3(%arg0: i32, %arg1: i32) -> (i32, i32) {
    %c0_i32 = arith.constant 0 : i32
    return %arg1, %arg0 : i32, i32
  }
}

module attributes {stable_mosaic.version = 11 : i64} {
  func.func @_conv3x3_relu_row_kernel(%arg0: i32, %arg1: i32, %arg2: memref<1x1x18x8xbf16, #tpu.memory_space<vmem>>, %arg3: memref<1x1x18x8xbf16, #tpu.memory_space<vmem>>, %arg4: memref<1x1x18x8xbf16, #tpu.memory_space<vmem>>, %arg5: memref<72x32xbf16, #tpu.memory_space<vmem>>, %arg6: memref<1x32xf32, #tpu.memory_space<vmem>>, %arg7: memref<1x1x16x32xbf16, #tpu.memory_space<vmem>>) attributes {dimension_semantics = [#tpu.dimension_semantics<parallel>, #tpu.dimension_semantics<parallel>], iteration_bounds = array<i64: 2, 16>, scalar_prefetch = 0 : i64, scratch_operands = 0 : i64, tpu.core_type = #tpu.core_type<tc>, window_params = [{transform_indices = @transform_0, window_bounds = array<i64: 1, 1, 18, 8>}, {transform_indices = @transform_1, window_bounds = array<i64: 1, 1, 18, 8>}, {transform_indices = @transform_2, window_bounds = array<i64: 1, 1, 18, 8>}, {pipeline_mode = #tpu.pipeline_mode<synchronous>, transform_indices = @transform_3, window_bounds = array<i64: 72, 32>}, {pipeline_mode = #tpu.pipeline_mode<synchronous>, transform_indices = @transform_4, window_bounds = array<i64: 1, 32>}, {transform_indices = @transform_5, window_bounds = array<i64: 1, 1, 16, 32>}]} {
    %cst = arith.constant 0.000000e+00 : f32
    %0 = vector.broadcast %cst : f32 to vector<16x32xf32>
    %c0 = arith.constant 0 : index
    %c0_0 = arith.constant 0 : index
    %c0_1 = arith.constant 0 : index
    %c0_2 = arith.constant 0 : index
    %1 = vector.load %arg2[%c0, %c0_0, %c0_1, %c0_2] : memref<1x1x18x8xbf16, #tpu.memory_space<vmem>>, vector<1x1x18x8xbf16>
    %c0_3 = arith.constant 0 : index
    %c0_4 = arith.constant 0 : index
    %c0_5 = arith.constant 0 : index
    %c0_6 = arith.constant 0 : index
    %2 = vector.load %arg3[%c0_3, %c0_4, %c0_5, %c0_6] : memref<1x1x18x8xbf16, #tpu.memory_space<vmem>>, vector<1x1x18x8xbf16>
    %c0_7 = arith.constant 0 : index
    %c0_8 = arith.constant 0 : index
    %c0_9 = arith.constant 0 : index
    %c0_10 = arith.constant 0 : index
    %3 = vector.load %arg4[%c0_7, %c0_8, %c0_9, %c0_10] : memref<1x1x18x8xbf16, #tpu.memory_space<vmem>>, vector<1x1x18x8xbf16>
    %4 = vector.shape_cast %1 : vector<1x1x18x8xbf16> to vector<18x8xbf16>
    %5 = vector.extract_strided_slice %4 {offsets = [0, 0], sizes = [16, 8], strides = [1, 1]} : vector<18x8xbf16> to vector<16x8xbf16>
    %c0_11 = arith.constant 0 : index
    %c0_12 = arith.constant 0 : index
    %6 = vector.load %arg5[%c0_11, %c0_12] : memref<72x32xbf16, #tpu.memory_space<vmem>>, vector<8x32xbf16>
    %cst_13 = arith.constant dense<0.000000e+00> : vector<16x32xf32>
    %7 = tpu.matmul %5, %6, %cst_13 {dimension_numbers = #tpu.dot_dimension_numbers<[1], [0], [0], [1], [0, 0, 1, 1], [], []>} : vector<16x8xbf16>, vector<8x32xbf16>, vector<16x32xf32> -> vector<16x32xf32>
    %8 = arith.addf %0, %7 : vector<16x32xf32>
    %9 = vector.extract_strided_slice %4 {offsets = [1, 0], sizes = [16, 8], strides = [1, 1]} : vector<18x8xbf16> to vector<16x8xbf16>
    %c8 = arith.constant 8 : index
    %c0_14 = arith.constant 0 : index
    %10 = vector.load %arg5[%c8, %c0_14] : memref<72x32xbf16, #tpu.memory_space<vmem>>, vector<8x32xbf16>
    %cst_15 = arith.constant dense<0.000000e+00> : vector<16x32xf32>
    %11 = tpu.matmul %9, %10, %cst_15 {dimension_numbers = #tpu.dot_dimension_numbers<[1], [0], [0], [1], [0, 0, 1, 1], [], []>} : vector<16x8xbf16>, vector<8x32xbf16>, vector<16x32xf32> -> vector<16x32xf32>
    %12 = arith.addf %8, %11 : vector<16x32xf32>
    %13 = vector.extract_strided_slice %4 {offsets = [2, 0], sizes = [16, 8], strides = [1, 1]} : vector<18x8xbf16> to vector<16x8xbf16>
    %c16 = arith.constant 16 : index
    %c0_16 = arith.constant 0 : index
    %14 = vector.load %arg5[%c16, %c0_16] : memref<72x32xbf16, #tpu.memory_space<vmem>>, vector<8x32xbf16>
    %cst_17 = arith.constant dense<0.000000e+00> : vector<16x32xf32>
    %15 = tpu.matmul %13, %14, %cst_17 {dimension_numbers = #tpu.dot_dimension_numbers<[1], [0], [0], [1], [0, 0, 1, 1], [], []>} : vector<16x8xbf16>, vector<8x32xbf16>, vector<16x32xf32> -> vector<16x32xf32>
    %16 = arith.addf %12, %15 : vector<16x32xf32>
    %17 = vector.shape_cast %2 : vector<1x1x18x8xbf16> to vector<18x8xbf16>
    %18 = vector.extract_strided_slice %17 {offsets = [0, 0], sizes = [16, 8], strides = [1, 1]} : vector<18x8xbf16> to vector<16x8xbf16>
    %c24 = arith.constant 24 : index
    %c0_18 = arith.constant 0 : index
    %19 = vector.load %arg5[%c24, %c0_18] : memref<72x32xbf16, #tpu.memory_space<vmem>>, vector<8x32xbf16>
    %cst_19 = arith.constant dense<0.000000e+00> : vector<16x32xf32>
    %20 = tpu.matmul %18, %19, %cst_19 {dimension_numbers = #tpu.dot_dimension_numbers<[1], [0], [0], [1], [0, 0, 1, 1], [], []>} : vector<16x8xbf16>, vector<8x32xbf16>, vector<16x32xf32> -> vector<16x32xf32>
    %21 = arith.addf %16, %20 : vector<16x32xf32>
    %22 = vector.extract_strided_slice %17 {offsets = [1, 0], sizes = [16, 8], strides = [1, 1]} : vector<18x8xbf16> to vector<16x8xbf16>
    %c32 = arith.constant 32 : index
    %c0_20 = arith.constant 0 : index
    %23 = vector.load %arg5[%c32, %c0_20] : memref<72x32xbf16, #tpu.memory_space<vmem>>, vector<8x32xbf16>
    %cst_21 = arith.constant dense<0.000000e+00> : vector<16x32xf32>
    %24 = tpu.matmul %22, %23, %cst_21 {dimension_numbers = #tpu.dot_dimension_numbers<[1], [0], [0], [1], [0, 0, 1, 1], [], []>} : vector<16x8xbf16>, vector<8x32xbf16>, vector<16x32xf32> -> vector<16x32xf32>
    %25 = arith.addf %21, %24 : vector<16x32xf32>
    %26 = vector.extract_strided_slice %17 {offsets = [2, 0], sizes = [16, 8], strides = [1, 1]} : vector<18x8xbf16> to vector<16x8xbf16>
    %c40 = arith.constant 40 : index
    %c0_22 = arith.constant 0 : index
    %27 = vector.load %arg5[%c40, %c0_22] : memref<72x32xbf16, #tpu.memory_space<vmem>>, vector<8x32xbf16>
    %cst_23 = arith.constant dense<0.000000e+00> : vector<16x32xf32>
    %28 = tpu.matmul %26, %27, %cst_23 {dimension_numbers = #tpu.dot_dimension_numbers<[1], [0], [0], [1], [0, 0, 1, 1], [], []>} : vector<16x8xbf16>, vector<8x32xbf16>, vector<16x32xf32> -> vector<16x32xf32>
    %29 = arith.addf %25, %28 : vector<16x32xf32>
    %30 = vector.shape_cast %3 : vector<1x1x18x8xbf16> to vector<18x8xbf16>
    %31 = vector.extract_strided_slice %30 {offsets = [0, 0], sizes = [16, 8], strides = [1, 1]} : vector<18x8xbf16> to vector<16x8xbf16>
    %c48 = arith.constant 48 : index
    %c0_24 = arith.constant 0 : index
    %32 = vector.load %arg5[%c48, %c0_24] : memref<72x32xbf16, #tpu.memory_space<vmem>>, vector<8x32xbf16>
    %cst_25 = arith.constant dense<0.000000e+00> : vector<16x32xf32>
    %33 = tpu.matmul %31, %32, %cst_25 {dimension_numbers = #tpu.dot_dimension_numbers<[1], [0], [0], [1], [0, 0, 1, 1], [], []>} : vector<16x8xbf16>, vector<8x32xbf16>, vector<16x32xf32> -> vector<16x32xf32>
    %34 = arith.addf %29, %33 : vector<16x32xf32>
    %35 = vector.extract_strided_slice %30 {offsets = [1, 0], sizes = [16, 8], strides = [1, 1]} : vector<18x8xbf16> to vector<16x8xbf16>
    %c56 = arith.constant 56 : index
    %c0_26 = arith.constant 0 : index
    %36 = vector.load %arg5[%c56, %c0_26] : memref<72x32xbf16, #tpu.memory_space<vmem>>, vector<8x32xbf16>
    %cst_27 = arith.constant dense<0.000000e+00> : vector<16x32xf32>
    %37 = tpu.matmul %35, %36, %cst_27 {dimension_numbers = #tpu.dot_dimension_numbers<[1], [0], [0], [1], [0, 0, 1, 1], [], []>} : vector<16x8xbf16>, vector<8x32xbf16>, vector<16x32xf32> -> vector<16x32xf32>
    %38 = arith.addf %34, %37 : vector<16x32xf32>
    %39 = vector.extract_strided_slice %30 {offsets = [2, 0], sizes = [16, 8], strides = [1, 1]} : vector<18x8xbf16> to vector<16x8xbf16>
    %c64 = arith.constant 64 : index
    %c0_28 = arith.constant 0 : index
    %40 = vector.load %arg5[%c64, %c0_28] : memref<72x32xbf16, #tpu.memory_space<vmem>>, vector<8x32xbf16>
    %cst_29 = arith.constant dense<0.000000e+00> : vector<16x32xf32>
    %41 = tpu.matmul %39, %40, %cst_29 {dimension_numbers = #tpu.dot_dimension_numbers<[1], [0], [0], [1], [0, 0, 1, 1], [], []>} : vector<16x8xbf16>, vector<8x32xbf16>, vector<16x32xf32> -> vector<16x32xf32>
    %42 = arith.addf %38, %41 : vector<16x32xf32>
    %c0_30 = arith.constant 0 : index
    %c0_31 = arith.constant 0 : index
    %43 = vector.load %arg6[%c0_30, %c0_31] : memref<1x32xf32, #tpu.memory_space<vmem>>, vector<1x32xf32>
    %44 = vector.broadcast %43 : vector<1x32xf32> to vector<16x32xf32>
    %45 = arith.addf %42, %44 : vector<16x32xf32>
    %cst_32 = arith.constant 0.000000e+00 : f32
    %46 = vector.broadcast %cst_32 : f32 to vector<16x32xf32>
    %47 = arith.maximumf %45, %46 : vector<16x32xf32>
    %48 = vector.shape_cast %47 : vector<16x32xf32> to vector<1x1x16x32xf32>
    %49 = arith.truncf %48 : vector<1x1x16x32xf32> to vector<1x1x16x32xbf16>
    %c0_33 = arith.constant 0 : index
    %c0_34 = arith.constant 0 : index
    %c0_35 = arith.constant 0 : index
    %c0_36 = arith.constant 0 : index
    %50 = vector.load %arg7[%c0_33, %c0_34, %c0_35, %c0_36] : memref<1x1x16x32xbf16, #tpu.memory_space<vmem>>, vector<1x1x16x32xbf16>
    tpu.vector_store %arg7[%c0_33, %c0_34, %c0_35, %c0_36], %49 {strides = array<i32>} : memref<1x1x16x32xbf16, #tpu.memory_space<vmem>>, vector<1x1x16x32xbf16>,
    return
  }
  func.func @transform_0(%arg0: i32, %arg1: i32) -> (i32, i32, i32, i32) {
    %c0_i32 = arith.constant 0 : i32
    %0 = arith.addi %arg1, %c0_i32 : i32
    %c0_i32_0 = arith.constant 0 : i32
    %c0_i32_1 = arith.constant 0 : i32
    %c0_i32_2 = arith.constant 0 : i32
    return %arg0, %0, %c0_i32_0, %c0_i32_1 : i32, i32, i32, i32
  }
  func.func @transform_1(%arg0: i32, %arg1: i32) -> (i32, i32, i32, i32) {
    %c1_i32 = arith.constant 1 : i32
    %0 = arith.addi %arg1, %c1_i32 : i32
    %c0_i32 = arith.constant 0 : i32
    %c0_i32_0 = arith.constant 0 : i32
    %c0_i32_1 = arith.constant 0 : i32
    return %arg0, %0, %c0_i32, %c0_i32_0 : i32, i32, i32, i32
  }
  func.func @transform_2(%arg0: i32, %arg1: i32) -> (i32, i32, i32, i32) {
    %c2_i32 = arith.constant 2 : i32
    %0 = arith.addi %arg1, %c2_i32 : i32
    %c0_i32 = arith.constant 0 : i32
    %c0_i32_0 = arith.constant 0 : i32
    %c0_i32_1 = arith.constant 0 : i32
    return %arg0, %0, %c0_i32, %c0_i32_0 : i32, i32, i32, i32
  }
  func.func @transform_3(%arg0: i32, %arg1: i32) -> (i32, i32) {
    %c0_i32 = arith.constant 0 : i32
    %c0_i32_0 = arith.constant 0 : i32
    %c0_i32_1 = arith.constant 0 : i32
    return %c0_i32, %c0_i32_0 : i32, i32
  }
  func.func @transform_4(%arg0: i32, %arg1: i32) -> (i32, i32) {
    %c0_i32 = arith.constant 0 : i32
    %c0_i32_0 = arith.constant 0 : i32
    %c0_i32_1 = arith.constant 0 : i32
    return %c0_i32, %c0_i32_0 : i32, i32
  }
  func.func @transform_5(%arg0: i32, %arg1: i32) -> (i32, i32, i32, i32) {
    %c0_i32 = arith.constant 0 : i32
    %c0_i32_0 = arith.constant 0 : i32
    %c0_i32_1 = arith.constant 0 : i32
    return %arg0, %arg1, %c0_i32, %c0_i32_0 : i32, i32, i32, i32
  }
}

</mosaic_0001>

<bundles_post_ra>
// kernel: tile.9
= control target key start
LH: loop header
LB: loop body
LE: loop exit
PB: predicated region body
PF: predicated region fallthrough
CT: control target
= control target key end

     0   :  { %s37_s8 = smov 16   ;;  %s38_s9 = smov 32   ;;  %vm7_vm0 = vcmask 130048   ;;  %vm13_vm1 = vcmask 523648   ;;  %vm19_vm2 = vcmask 392448   ;;  %vm25_vm3 = vcmask 261248   ;;  %s55_s0 = inlined_call_operand.vmem [shape: f32[4,16], index: 0, kind: input, shape index: {}]   ;;  %s56_s1 = inlined_call_operand.vmem [shape: f32[64], index: 1, kind: output, shape index: {}]  }
   0x1   :  { %v4_v0 = vld [vmem:[%s55_s0] sm:$0xf]  ;;  %s36_s0 = smov 48  }
   0x2   :  { %5 = vst [vmem:[#allocation1] sm:$0xf] %v4_v0 }
   0x9   :  { %v10_v1 = vld [vmem:[#allocation1 + $0x3] sm:$0x1]   ;;  %v22_v2 = vld [vmem:[#allocation1 + $0x1] sm:$0x1]   ;;  %v16_v3 = vld [vmem:[#allocation1 + $0x2] sm:$0x1]  }
   0xa   :  { %11 = vrot.lane.b32.xlu0 %v10_v1, %s36_s0  ;;  %23 = vrot.lane.b32.xlu1 %v22_v2, %s37_s8  ;;  %v6_v4 = vld [vmem:[#allocation1] sm:$0x1]  }
   0xb   :  { %8 = vst.msk [vmem:[#allocation0] sm:$0x1] %vm7_vm0, %v6_v4  }
  0x12   :  { %17 = vrot.lane.b32.xlu0 %v16_v3, %s38_s9 }
  0x7c   :  { %v12_v5 = vpop.permute.xlu0 %11   ;;  %v24_v6 = vpop.permute.xlu1 %23  }
  0x7d   :  { %14 = vst.msk [vmem:[#allocation0] sm:$0x1] %vm13_vm1, %v12_v5  }
  0x84   :  { %v18_v7 = vpop.permute.xlu0 %17  }
  0x85   :  { %20 = vst.msk [vmem:[#allocation0] sm:$0x1] %vm19_vm2, %v18_v7  }
  0x86   :  { %26 = vst.msk [vmem:[#allocation0] sm:$0x1] %vm25_vm3, %v24_v6  }
  0x8d   :  { %v29_v8 = vld [vmem:[#allocation0] sm:$0x1] }
  0x8e   :  { %32 = vst [vmem:[%s56_s1] sm:$0x1] %v29_v8 }

// kernel: tile.8
= control target key start
LH: loop header
LB: loop body
LE: loop exit
PB: predicated region body
PF: predicated region fallthrough
CT: control target
= control target key end

     0   :  { %2 = vsyncpa [#allocation1], 0  ;;  %s48_s8 = smov [#allocation0]   ;;  %s65_s0 = inlined_call_operand.hbm [shape: f32[16], index: 0, kind: input, shape index: {}]   ;;  %s66_s1 = inlined_call_operand.vmem [shape: f32[4,16], index: 1, kind: output, shape index: {}]  }
   0x1   :  { %s8_s0 = sshll.u32 %s65_s0, 4  ;;  %s10_s9 = sshll.u32 %s48_s8, 4  ;;  %s9_s0 = int_to_ptr.hbm [resolvable:$true] %s8_s0  ;;  %s11_s9 = int_to_ptr.vmem [resolvable:$true] %s10_s9 }
   0x2   :  { %13 = dma.hbm_to_vmem [thread:$0]  %s9_s0, 16, %s11_s9, [#allocation1]  }
   0x3   :  { %46 = dma.done.wait [#allocation1], 16  }
   0x4   :  { %47 = vsyncadd [#allocation1], 4294967280  ;;  %v18_v0 = vld [vmem:[#allocation0] ss:$0 sm:$0xff] }
   0x5   :  { %19 = vst [vmem:[%s66_s1] sm:$0xf] %v18_v0 }
   0x6   :  { %20 = vsyncpa [#allocation1], 1 }

</bundles_post_ra>
